<compile_context>
chip_gen: v6e
topology: v6e:2x2x1
jax: 0.10.0
libtpu: 0.0.40
codegen_flags: <defaults>
</compile_context>

<pallas_src>
import math

import jax
import jax.numpy as jnp
from jax.experimental import pallas as pl
from jax.experimental.pallas import tpu as pltpu


def _drop_path_kernel(scale_ref, x_ref, o_ref):
    """scale_ref: (TB, 1) per-sample scale (0 or 1/keep) in x's dtype.
    x_ref/o_ref: (TB, FT) tiles. Pure broadcast-multiply, native dtype."""
    o_ref[...] = x_ref[...] * scale_ref[...]


def drop_path(x: jax.Array, p: float, key: jax.Array, training: bool = True) -> jax.Array:
    """Equivalent of DropPath.forward. Identity when p == 0 or not training."""
    if p == 0.0 or not training:
        return x
    keep = 1.0 - p

    B = x.shape[0]
    F = math.prod(x.shape[1:])
    x2 = x.reshape(B, F)

    # Per-sample Bernoulli(keep) mask scaled by 1/keep (exact torch semantics),
    # cast to the input dtype so the in-kernel multiply stays in native dtype.
    mask = jax.random.bernoulli(key, p=keep, shape=(B, 1))
    scales = (mask.astype(jnp.float32) * (1.0 / keep)).astype(x.dtype)

    # ---- Tile selection -----------------------------------------------------
    # Batch tile: 8 rows (one sublane group) or the whole batch if smaller.
    TB = B if B <= 8 else 8

    # Feature tile: lane-dense (multiple of 128) and ~<= 4 MiB per block so the
    # double-buffered in+out footprint stays well under v7x's scoped VMEM.
    itemsize = jnp.dtype(x.dtype).itemsize
    if F % 128 == 0:
        max_ft = max(128, ((4 * 1024 * 1024) // (TB * itemsize)) // 128 * 128)
        FT = min(F, max_ft)
    else:
        # Fall back to the full (unaligned) feature extent; block == full dim
        # satisfies the (8,128) tiling rule.
        FT = F

    grid = (pl.cdiv(B, TB), pl.cdiv(F, FT))

    out = pl.pallas_call(
        _drop_path_kernel,
        out_shape=jax.ShapeDtypeStruct((B, F), x.dtype),
        grid_spec=pl.GridSpec(
            grid=grid,
            in_specs=[
                pl.BlockSpec((TB, 1), lambda b, f: (b, 0)),    # per-sample scales
                pl.BlockSpec((TB, FT), lambda b, f: (b, f)),   # activations
            ],
            out_specs=pl.BlockSpec((TB, FT), lambda b, f: (b, f)),
        ),
        compiler_params=pltpu.CompilerParams(
            # Every output block is written exactly once -> both axes parallel;
            # lets v7x shard the grid across its two TensorCores.
            dimension_semantics=("parallel", "parallel"),
        ),
    )(scales, x2)
    return out.reshape(x.shape)


if __name__ == "__main__":
    key = jax.random.PRNGKey(0)
    kx, kmask = jax.random.split(key)

    # Small shapes consistent with the CIFAR model: (B, C, H, W) = (2, 4, 16, 16).
    x = jax.random.normal(kx, (2, 4, 16, 16), dtype=jnp.float32)
    p = 0.5
    keep = 1.0 - p

    # Training mode: per-sample stochastic depth via the Pallas kernel.
    y = jax.block_until_ready(drop_path(x, p=p, key=kmask, training=True))

    # Eval mode / p == 0: identity (no kernel launch).
    y_eval = jax.block_until_ready(drop_path(x, p=p, key=kmask, training=False))
    assert jnp.allclose(y_eval, x)
    y_p0 = jax.block_until_ready(drop_path(x, p=0.0, key=kmask, training=True))
    assert jnp.allclose(y_p0, x)

    # Sanity: each sample is either fully dropped (zeros) or scaled by 1/keep.
    for b in range(x.shape[0]):
        kept = bool(jnp.allclose(y[b], x[b] / keep, atol=1e-5, rtol=1e-5))
        dropped = bool(jnp.allclose(y[b], 0.0))
        assert kept or dropped, f"sample {b} has an invalid drop-path mask"

    print("KERNEL_OK")
</pallas_src>

<mosaic_0001>
module attributes {stable_mosaic.version = 11 : i64} {
  func.func @_drop_path_kernel(%arg0: i32, %arg1: i32, %arg2: memref<2x1xf32, #tpu.memory_space<vmem>>, %arg3: memref<2x1024xf32, #tpu.memory_space<vmem>>, %arg4: memref<2x1024xf32, #tpu.memory_space<vmem>>) attributes {dimension_semantics = [#tpu.dimension_semantics<parallel>, #tpu.dimension_semantics<parallel>], iteration_bounds = array<i64: 1, 1>, scalar_prefetch = 0 : i64, scratch_operands = 0 : i64, tpu.core_type = #tpu.core_type<tc>, window_params = [{transform_indices = @transform_0, window_bounds = array<i64: 2, 1>}, {transform_indices = @transform_1, window_bounds = array<i64: 2, 1024>}, {transform_indices = @transform_2, window_bounds = array<i64: 2, 1024>}]} {
    %c0 = arith.constant 0 : index
    %c0_0 = arith.constant 0 : index
    %0 = vector.load %arg3[%c0, %c0_0] : memref<2x1024xf32, #tpu.memory_space<vmem>>, vector<2x1024xf32>
    %c0_1 = arith.constant 0 : index
    %c0_2 = arith.constant 0 : index
    %1 = vector.load %arg2[%c0_1, %c0_2] : memref<2x1xf32, #tpu.memory_space<vmem>>, vector<2x1xf32>
    %2 = vector.broadcast %1 : vector<2x1xf32> to vector<2x1024xf32>
    %3 = arith.mulf %0, %2 : vector<2x1024xf32>
    %c0_3 = arith.constant 0 : index
    %c0_4 = arith.constant 0 : index
    %4 = vector.load %arg4[%c0_3, %c0_4] : memref<2x1024xf32, #tpu.memory_space<vmem>>, vector<2x1024xf32>
    tpu.vector_store %arg4[%c0_3, %c0_4], %3 {strides = array<i32>} : memref<2x1024xf32, #tpu.memory_space<vmem>>, vector<2x1024xf32>,
    return
  }
  func.func @transform_0(%arg0: i32, %arg1: i32) -> (i32, i32) {
    %c0_i32 = arith.constant 0 : i32
    %c0_i32_0 = arith.constant 0 : i32
    return %arg0, %c0_i32 : i32, i32
  }
  func.func @transform_1(%arg0: i32, %arg1: i32) -> (i32, i32) {
    %c0_i32 = arith.constant 0 : i32
    return %arg0, %arg1 : i32, i32
  }
  func.func @transform_2(%arg0: i32, %arg1: i32) -> (i32, i32) {
    %c0_i32 = arith.constant 0 : i32
    return %arg0, %arg1 : i32, i32
  }
}

</mosaic_0001>

<bundles_post_ra>
// kernel: tpu_custom_call.1
= control target key start
LH: loop header
LB: loop body
LE: loop exit
PB: predicated region body
PF: predicated region fallthrough
CT: control target
= control target key end

     0   :  { %7 = vsyncpa [#allocation3], 0  ;;  %s135_s0 = inlined_call_operand.vmem [shape: f32[2,1], index: 0, kind: input, shape index: {}]   ;;  %s136_s1 = inlined_call_operand.hbm [shape: f32[2,1024], index: 1, kind: input, shape index: {}]   ;;  %s137_s2 = inlined_call_operand.hbm [shape: f32[2,1024], index: 2, kind: output, shape index: {}]  }
   0x1   :  { %8 = vsyncpa [#allocation4], 0  ;;  %s107_s9 = smov [#allocation2]  }
   0x2   :  { %s17_s10 = sshll.u32 %s107_s9, 4  ;;  %s18_s10 = int_to_ptr.vmem [resolvable:$true] %s17_s10 }
   0x3   :  { %s71_s11 = scalar_lea.vmem %s18_s10, 256  ;;  %p76_p1 = scmp.lt.s32.totalorder %s18_s10, %s18_s10 }
   0x4   :  { %p72_p0 = scmp.ne.s32.totalorder %s18_s10, %s71_s11  ;;  %p77_p2 = scmp.lt.s32.totalorder %s71_s11, %s71_s11 }
   0x6   :  { %p78_p3 = por %p77_p2, %p76_p1 }
   0x8   :  { %p79_p4 = pnand %p78_p3, %p72_p0 }
   0xa   :  { %82 = shalt.err (!%p79_p4)
}
   0xb   :  { %20 = dma.hbm_to_vmem [thread:$0]  %s136_s1, 256, %s18_s10, [#allocation3]  }
   0xc   :  { %103 = dma.done.wait [#allocation3], 256  }
   0xd   :  { %104 = vsyncadd [#allocation3], 4294967040  ;;  %v108_v0 = vmov 0   ;;  %v26_v1 = vld [vmem:[%s135_s0] sm:$0x3]  ;;  %v34_v4 = vlaneseq  ;;  %v25_v10 = vld [vmem:[#allocation2 + $0x8] sm:$0xff] }
   0xe   :  { %62 = vset.pattern.permute.xlu0 %v108_v0  ;;  %v109_v2 = vmov 269488144   ;;  %v24_v9 = vld [vmem:[#allocation2] sm:$0xff]  ;;  %s110_s16 = smov [#allocation5]  }
   0xf   :  { %29 = vperm.xlu0 %62, %v26_v1   ;;  %v32_v3 = vunpack.c.l.s4 %v109_v2  ;;  %v35_v6 = vshrl.u32 %v34_v4, 7  ;;  %s49_s1 = sshll.u32 %s110_s16, 4  ;;  %s50_s1 = int_to_ptr.vmem [resolvable:$true] %s49_s1 }
  0x10   :  { %s83_s17 = scalar_lea.vmem %s50_s1, 256  ;;  %p88_p6 = scmp.lt.s32.totalorder %s50_s1, %s50_s1 }
  0x11   :  { %v33_v5 = vunpack.c.0.s8 %v32_v3  ;;  %p84_p5 = scmp.ne.s32.totalorder %s50_s1, %s83_s17  ;;  %p89_p7 = scmp.lt.s32.totalorder %s83_s17, %s83_s17 }
  0x13   :  { %v36_v7 = vsub.s32 %v33_v5, %v35_v6  ;;  %p90_p8 = por %p89_p7, %p88_p6 }
  0x15   :  { %p91_p9 = pnand %p90_p8, %p84_p5 }
  0x8a   :  { %v30_v8 = vpop.permute.xlu0 %29 }
  0x8b   :  { %v37_v11 = vrot.slane %v30_v8, %v36_v7 }
  0x8d   :  { %v39_v12 = vmul.f32 %v37_v11, %v24_v9  ;;  %v40_v13 = vmul.f32 %v37_v11, %v25_v10 }
  0x8f   :  { %41 = vst [vmem:[#allocation5] sm:$0xff] %v39_v12  ;;  %42 = vst [vmem:[#allocation5 + $0x8] sm:$0xff] %v40_v13 }
  0x90   :  { %94 = shalt.err (!%p91_p9)
}
  0x91   :  { %52 = dma.vmem_to_hbm [thread:$0]  %s50_s1, 256, %s137_s2, [#allocation4]  }
  0x92   :  { %105 = dma.done.wait [#allocation4], 256  }
  0x93   :  { %106 = vsyncadd [#allocation4], 4294967040 }
  0x94   :  { %56 = vsyncpa [#allocation3], 1 }
  0x95   :  { %57 = vsyncpa [#allocation4], 1 }

</bundles_post_ra>
